<compile_context>
chip_gen: v6e
topology: v6e:2x2x1
jax: 0.10.0
libtpu: 0.0.40
codegen_flags: <defaults>
</compile_context>

<pallas_src>
import math

import jax
import jax.numpy as jnp
from jax.experimental import pallas as pl
from jax.experimental.pallas import tpu as pltpu

INPUT_DIM = 16
HIDDEN_DIM = 32
BATCH = 2


def _gru_cell_kernel(x_ref, h_ref, w_ref, b_ref, out_ref):
    D = x_ref.shape[1]
    H = h_ref.shape[1]

    x = x_ref[...]            # (B, D)   f32
    h = h_ref[...]            # (B, H)   f32
    w = w_ref[...]            # (D+H, 3H) f32, rows = [x-part | h-part], cols = [z | r | c]
    b = b_ref[...]            # (1, 3H)  f32

    # One x-matmul for all three gates, bias folded in once.
    px = jnp.dot(x, w[:D, :], preferred_element_type=jnp.float32) + b        # (B, 3H)
    # One h-matmul for the update + reset gates.
    ph_zr = jnp.dot(h, w[D:, :2 * H], preferred_element_type=jnp.float32)    # (B, 2H)

    # Single sigmoid over the packed z|r slab.
    zr = jax.nn.sigmoid(px[:, :2 * H] + ph_zr)                               # (B, 2H)
    z = zr[:, :H]
    r = zr[:, H:]

    # Candidate: tanh(x @ Wcx + (r*h) @ Wch + b_c).  Note Wc·(r*h), not r·(Wc·h).
    pc = px[:, 2 * H:] + jnp.dot(
        r * h, w[D:, 2 * H:], preferred_element_type=jnp.float32)            # (B, H)
    h_tilde = jnp.tanh(pc)

    h_new = (1.0 - z) * h + z * h_tilde
    out_ref[...] = jnp.clip(h_new, -1.0, 1.0).astype(out_ref.dtype)


@jax.jit
def gru_cell_forward(x, h, w_packed, b_packed):
    """x: (B, D), h: (B, H), w_packed: (D+H, 3H), b_packed: (1, 3H) -> (B, H)."""
    B, _ = x.shape
    H = h.shape[1]
    vmem = pl.BlockSpec(memory_space=pltpu.MemorySpace.VMEM)
    return pl.pallas_call(
        _gru_cell_kernel,
        out_shape=jax.ShapeDtypeStruct((B, H), jnp.float32),
        in_specs=[vmem, vmem, vmem, vmem],
        out_specs=vmem,
        input_output_aliases={1: 0},   # update the hidden state in place
    )(x, h, w_packed, b_packed)


def init_params(key, input_dim, hidden_dim):
    """Kaiming-uniform-style init (as in reset_parameters), weights stored
    transposed as (in_features, hidden) and packed [update | reset | candidate]
    along the lane (output) axis."""
    ks = jax.random.split(key, 6)
    fan_in = input_dim + hidden_dim
    bound = 1.0 / math.sqrt(fan_in)

    def w(k):
        return jax.random.uniform(k, (fan_in, hidden_dim), jnp.float32, -bound, bound)

    def b(k):
        return jax.random.uniform(k, (1, hidden_dim), jnp.float32, -bound, bound)

    w_u, w_r, w_c = w(ks[0]), w(ks[1]), w(ks[2])
    b_u, b_r, b_c = b(ks[3]), b(ks[4]), b(ks[5])

    w_packed = jnp.concatenate([w_u, w_r, w_c], axis=1)   # (D+H, 3H)
    b_packed = jnp.concatenate([b_u, b_r, b_c], axis=1)   # (1, 3H)
    return w_packed, b_packed


def reference_forward(x, h, w_packed, b_packed):
    """Pure-JAX mirror of the PyTorch forward (explicit concats)."""
    H = h.shape[1]
    w_u, w_r, w_c = w_packed[:, :H], w_packed[:, H:2 * H], w_packed[:, 2 * H:]
    b_u, b_r, b_c = b_packed[:, :H], b_packed[:, H:2 * H], b_packed[:, 2 * H:]

    inputs = jnp.concatenate([x, h], axis=-1)
    z = jax.nn.sigmoid(inputs @ w_u + b_u)
    r = jax.nn.sigmoid(inputs @ w_r + b_r)
    h_concat = jnp.concatenate([x, r * h], axis=-1)
    h_tilde = jnp.tanh(h_concat @ w_c + b_c)
    return jnp.clip((1.0 - z) * h + z * h_tilde, -1.0, 1.0)


if __name__ == "__main__":
    key = jax.random.PRNGKey(0)
    pkey, xkey, hkey = jax.random.split(key, 3)
    w_packed, b_packed = init_params(pkey, INPUT_DIM, HIDDEN_DIM)

    x = jax.random.normal(xkey, (BATCH, INPUT_DIM), jnp.float32)
    h = jax.random.normal(hkey, (BATCH, HIDDEN_DIM), jnp.float32)

    # Reference computed first (the kernel output aliases h's buffer).
    h_expected = reference_forward(x, h, w_packed, b_packed)

    h_new = jax.block_until_ready(gru_cell_forward(x, h, w_packed, b_packed))

    assert h_new.shape == (BATCH, HIDDEN_DIM)
    assert jnp.allclose(h_new, h_expected, atol=1e-5, rtol=1e-5)
    print("KERNEL_OK")
</pallas_src>

<mosaic_0001>
module attributes {stable_mosaic.version = 11 : i64} {
  func.func @_gru_cell_kernel(%arg0: memref<2x16xf32, #tpu.memory_space<vmem>>, %arg1: memref<2x32xf32, #tpu.memory_space<vmem>>, %arg2: memref<48x96xf32, #tpu.memory_space<vmem>>, %arg3: memref<1x96xf32, #tpu.memory_space<vmem>>, %arg4: memref<2x32xf32, #tpu.memory_space<vmem>>) attributes {dimension_semantics = [], scalar_prefetch = 0 : i64, scratch_operands = 0 : i64, tpu.core_type = #tpu.core_type<tc>} {
    %c0 = arith.constant 0 : index
    %c0_0 = arith.constant 0 : index
    %0 = vector.load %arg0[%c0, %c0_0] : memref<2x16xf32, #tpu.memory_space<vmem>>, vector<2x16xf32>
    %c0_1 = arith.constant 0 : index
    %c0_2 = arith.constant 0 : index
    %1 = vector.load %arg1[%c0_1, %c0_2] : memref<2x32xf32, #tpu.memory_space<vmem>>, vector<2x32xf32>
    %c0_3 = arith.constant 0 : index
    %c0_4 = arith.constant 0 : index
    %2 = vector.load %arg2[%c0_3, %c0_4] : memref<48x96xf32, #tpu.memory_space<vmem>>, vector<48x96xf32>
    %c0_5 = arith.constant 0 : index
    %c0_6 = arith.constant 0 : index
    %3 = vector.load %arg3[%c0_5, %c0_6] : memref<1x96xf32, #tpu.memory_space<vmem>>, vector<1x96xf32>
    %4 = vector.extract_strided_slice %2 {offsets = [0, 0], sizes = [16, 96], strides = [1, 1]} : vector<48x96xf32> to vector<16x96xf32>
    %cst = arith.constant dense<0.000000e+00> : vector<2x96xf32>
    %5 = tpu.matmul %0, %4, %cst {dimension_numbers = #tpu.dot_dimension_numbers<[1], [0], [0], [1], [0, 0, 1, 1], [], []>} : vector<2x16xf32>, vector<16x96xf32>, vector<2x96xf32> -> vector<2x96xf32>
    %6 = vector.broadcast %3 : vector<1x96xf32> to vector<2x96xf32>
    %7 = arith.addf %5, %6 : vector<2x96xf32>
    %8 = vector.extract_strided_slice %2 {offsets = [16, 0], sizes = [32, 64], strides = [1, 1]} : vector<48x96xf32> to vector<32x64xf32>
    %cst_7 = arith.constant dense<0.000000e+00> : vector<2x64xf32>
    %9 = tpu.matmul %1, %8, %cst_7 {dimension_numbers = #tpu.dot_dimension_numbers<[1], [0], [0], [1], [0, 0, 1, 1], [], []>} : vector<2x32xf32>, vector<32x64xf32>, vector<2x64xf32> -> vector<2x64xf32>
    %10 = vector.extract_strided_slice %7 {offsets = [0, 0], sizes = [2, 64], strides = [1, 1]} : vector<2x96xf32> to vector<2x64xf32>
    %11 = arith.addf %10, %9 : vector<2x64xf32>
    %12 = arith.negf %11 : vector<2x64xf32>
    %13 = math.exp %12 : vector<2x64xf32>
    %cst_8 = arith.constant 1.000000e+00 : f32
    %14 = vector.broadcast %cst_8 : f32 to vector<2x64xf32>
    %15 = arith.addf %14, %13 : vector<2x64xf32>
    %16 = arith.divf %14, %15 : vector<2x64xf32>
    %17 = vector.extract_strided_slice %16 {offsets = [0, 0], sizes = [2, 32], strides = [1, 1]} : vector<2x64xf32> to vector<2x32xf32>
    %18 = vector.extract_strided_slice %16 {offsets = [0, 32], sizes = [2, 32], strides = [1, 1]} : vector<2x64xf32> to vector<2x32xf32>
    %19 = vector.extract_strided_slice %7 {offsets = [0, 64], sizes = [2, 32], strides = [1, 1]} : vector<2x96xf32> to vector<2x32xf32>
    %20 = arith.mulf %18, %1 : vector<2x32xf32>
    %21 = vector.extract_strided_slice %2 {offsets = [16, 64], sizes = [32, 32], strides = [1, 1]} : vector<48x96xf32> to vector<32x32xf32>
    %cst_9 = arith.constant dense<0.000000e+00> : vector<2x32xf32>
    %22 = tpu.matmul %20, %21, %cst_9 {dimension_numbers = #tpu.dot_dimension_numbers<[1], [0], [0], [1], [0, 0, 1, 1], [], []>} : vector<2x32xf32>, vector<32x32xf32>, vector<2x32xf32> -> vector<2x32xf32>
    %23 = arith.addf %19, %22 : vector<2x32xf32>
    %24 = math.tanh %23 : vector<2x32xf32>
    %cst_10 = arith.constant 1.000000e+00 : f32
    %25 = vector.broadcast %cst_10 : f32 to vector<2x32xf32>
    %26 = arith.subf %25, %17 : vector<2x32xf32>
    %27 = arith.mulf %26, %1 : vector<2x32xf32>
    %28 = arith.mulf %17, %24 : vector<2x32xf32>
    %29 = arith.addf %27, %28 : vector<2x32xf32>
    %cst_11 = arith.constant -1.000000e+00 : f32
    %cst_12 = arith.constant 1.000000e+00 : f32
    %30 = vector.broadcast %cst_11 : f32 to vector<2x32xf32>
    %31 = arith.maximumf %30, %29 : vector<2x32xf32>
    %32 = vector.broadcast %cst_12 : f32 to vector<2x32xf32>
    %33 = arith.minimumf %32, %31 : vector<2x32xf32>
    %c0_13 = arith.constant 0 : index
    %c0_14 = arith.constant 0 : index
    %34 = vector.load %arg4[%c0_13, %c0_14] : memref<2x32xf32, #tpu.memory_space<vmem>>, vector<2x32xf32>
    tpu.vector_store %arg4[%c0_13, %c0_14], %33 {strides = array<i32>} : memref<2x32xf32, #tpu.memory_space<vmem>>, vector<2x32xf32>,
    return
  }
}

</mosaic_0001>

<bundles_post_ra>
// kernel: gru_cell_forward.1
= control target key start
LH: loop header
LB: loop body
LE: loop exit
PB: predicated region body
PF: predicated region fallthrough
CT: control target
= control target key end

     0   :  { %9 = vsyncpa [#allocation3], 0  ;;  %s534_s0 = inlined_call_operand.vmem [shape: f32[2,16], index: 0, kind: input, shape index: {}]   ;;  %s535_s1 = inlined_call_operand.hbm [shape: f32[2,32], index: 1, kind: input, shape index: {}, may-alias: {1,4}]   ;;  %s536_s2 = inlined_call_operand.hbm [shape: f32[48,96], index: 2, kind: input, shape index: {}]   ;;  %s537_s3 = inlined_call_operand.vmem [shape: f32[1,96], index: 3, kind: input, shape index: {}]   ;;  %s538_s4 = inlined_call_operand.hbm [shape: f32[2,32], index: 4, kind: output, shape index: {}, may-alias: {1,4}]  }
   0x1   :  { %10 = vsyncpa [#allocation6], 0 }
   0x2   :  { %11 = vsyncpa [#allocation4], 0  ;;  %s473_s15 = smov [#allocation2]   ;;  %s474_s17 = smov [#allocation5]  }
   0x3   :  { %s20_s16 = sshll.u32 %s473_s15, 4  ;;  %s29_s18 = sshll.u32 %s474_s17, 4  ;;  %s21_s16 = int_to_ptr.vmem [resolvable:$true] %s20_s16  ;;  %s30_s18 = int_to_ptr.vmem [resolvable:$true] %s29_s18 }
   0x4   :  { %s415_s19 = scalar_lea.vmem %s21_s16, 32  ;;  %p420_p1 = scmp.lt.s32.totalorder %s21_s16, %s21_s16 }
   0x5   :  { %p416_p0 = scmp.ne.s32.totalorder %s21_s16, %s415_s19  ;;  %p421_p2 = scmp.lt.s32.totalorder %s415_s19, %s415_s19 }
   0x7   :  { %p422_p3 = por %p421_p2, %p420_p1 }
   0x9   :  { %p423_p4 = pnand %p422_p3, %p416_p0 }
   0xb   :  { %426 = shalt.err (!%p423_p4)
}
   0xc   :  { %23 = dma.hbm_to_vmem [thread:$0]  %s535_s1, 32, %s21_s16, [#allocation3]  }
   0xd   :  { %s435_s22 = scalar_lea.vmem %s30_s18, 768  ;;  %p440_p6 = scmp.lt.s32.totalorder %s30_s18, %s30_s18 }
   0xe   :  { %p436_p5 = scmp.ne.s32.totalorder %s30_s18, %s435_s22  ;;  %p441_p7 = scmp.lt.s32.totalorder %s435_s22, %s435_s22 }
  0x10   :  { %p442_p8 = por %p441_p7, %p440_p6 }
  0x12   :  { %p443_p9 = pnand %p442_p8, %p436_p5 }
  0x14   :  { %446 = shalt.err (!%p443_p9)
}
  0x15   :  { %s475_s23 = smov 128   ;;  %s476_s24 = smov 8  }
  0x16   :  { %35 = dma.hbm_to_vmem [thread:$0]  %s536_s2, 768, %s30_s18, [#allocation6], %s475_s23, %s475_s23, %s476_s24  }
  0x17   :  { %467 = dma.done.wait [#allocation3], 32  }
  0x18   :  { %468 = vsyncadd [#allocation3], 4294967264 }
  0x19   :  { %469 = dma.done.wait [#allocation6], 768  }
  0x1a   :  { %470 = vsyncadd [#allocation6], 4294966528  ;;  %v477_v0 = vmov 0.0   ;;  %vm478_vm0 = vmmov 0   ;;  %v47_v1 = vld [vmem:[#allocation5 + $0x8] sm:$0xff]  ;;  %v46_v3 = vld [vmem:[#allocation5] sm:$0xff] }
  0x1b   :  { %362 = vmatprep.subr.mxu0 %v477_v0  ;;  %369 = vmatprep.subr.mxu1 %v477_v0  ;;  %v51_v2 = vld [vmem:[#allocation5 + $0x28] sm:$0xff]  ;;  %v50_v4 = vld [vmem:[#allocation5 + $0x20] sm:$0xff]  ;;  %v44_v5 = vld [vmem:[%s534_s0] sm:$0x3]  ;;  %vm59_vm1 = vcmask 130048   ;;  %vm133_vm2 = vcmask 261120  }
  0x1c   :  { %366 = vmatprep.mubr.msk.f32.mxu0 %vm478_vm0, %v477_v0  ;;  %377 = vmatprep.mubr.msk.f32.mxu1 %vm478_vm0, %v477_v0  ;;  %v49_v6 = vld [vmem:[#allocation5 + $0x18] sm:$0xff]  ;;  %v48_v7 = vld [vmem:[#allocation5 + $0x10] sm:$0xff]  ;;  %s479_s27 = smov 32   ;;  %s480_s0 = smov 64   ;;  %vm325_vm3 = vcmask 254976  }
  0x1d   :  { %363 = vmatpush3.msra.mxu0 %v47_v1  ;;  %370 = vmatpush3.msra.mxu1 %v51_v2  ;;  %v45_v8 = vld [vmem:[#allocation2] sm:$0x3]  ;;  %s482_s30 = smov [#allocation7]  }
  0x1e   :  { %364 = vmatprep.subr.mxu0 %v477_v0  ;;  %371 = vmatprep.subr.mxu1 %v477_v0  ;;  %v343_v9 = vld [vmem:[%s537_s3] ss:$0 sm:$0xff]  ;;  %s481_s3 = smov 96   ;;  %s333_s5 = sshll.u32 %s482_s30, 4  ;;  %s334_s5 = int_to_ptr.vmem [resolvable:$true] %s333_s5 }
  0x1f   :  { %365 = vmatpush3.msra.mxu0 %v46_v3  ;;  %372 = vmatpush3.msra.mxu1 %v50_v4  ;;  %s447_s6 = scalar_lea.vmem %s334_s5, 32  ;;  %p452_p11 = scmp.lt.s32.totalorder %s334_s5, %s334_s5 }
  0x20   :  { %367 = vmatmul.mubr.msk.f32.vlgmr.msra.gmra.mxu0 %vm59_vm1, %v44_v5  ;;  %373 = vmatprep.subr.mxu1 %v477_v0  ;;  %p448_p10 = scmp.ne.s32.totalorder %s334_s5, %s447_s6  ;;  %p453_p12 = scmp.lt.s32.totalorder %s447_s6, %s447_s6 }
  0x21   :  { %374 = vmatpush3.msra.mxu1 %v49_v6  ;;  %214 = vrot.lane.b32.xlu0 %v45_v8, %s479_s27 }
  0x22   :  { %375 = vmatprep.subr.mxu1 %v477_v0  ;;  %380 = vmatprep.subr.mxu0 %v477_v0  ;;  %p454_p13 = por %p453_p12, %p452_p11 }
  0x23   :  { %376 = vmatpush3.msra.mxu1 %v48_v7  ;;  %388 = vmatprep.mubr.msk.f32.mxu0 %vm478_vm0, %v477_v0 }
  0x24   :  { %378 = vmatmul.mubr.msk.f32.vlgmr.msra.gmra.mxu1 %vm133_vm2, %v45_v8  ;;  %229 = vrot.lane.b32.xlu1 %v50_v4, %s480_s0  ;;  %p455_p0 = pnand %p454_p13, %p448_p10 }
  0x25   :  { %231 = vrot.lane.b32.xlu0 %v51_v2, %s480_s0 }
  0x28   :  { %227 = vrot.lane.b32.xlu1 %v49_v6, %s480_s0 }
  0x29   :  { %225 = vrot.lane.b32.xlu0 %v48_v7, %s480_s0 }
  0x93   :  { %v215_v17 = vpop.permute.xlu0 %214 }
  0x96   :  { %v230_v19 = vpop.permute.xlu1 %229 }
  0x97   :  { %v232_v18 = vpop.permute.xlu0 %231 }
  0x98   :  { %381 = vmatpush3.msra.mxu0 %v232_v18 }
  0x99   :  { %382 = vmatprep.subr.mxu0 %v477_v0 }
  0x9a   :  { %383 = vmatpush3.msra.mxu0 %v230_v19  ;;  %v228_v20 = vpop.permute.xlu1 %227 }
  0x9b   :  { %384 = vmatprep.subr.mxu0 %v477_v0  ;;  %v226_v21 = vpop.permute.xlu0 %225 }
  0x9c   :  { %385 = vmatpush3.msra.mxu0 %v228_v20 }
  0x9d   :  { %386 = vmatprep.subr.mxu0 %v477_v0 }
  0x9e   :  { %387 = vmatpush3.msra.mxu0 %v226_v21 }
  0xe0   :  { %v129_v10 = vpop.f32.mrf.mxu0 }
  0xe1   :  { %v130_v11 = vadd.f32 %v343_v9, %v129_v10 }
  0xe2   :  { %v368_v12 = vpop.f32.mrf.mxu0 }
  0xe4   :  { %v203_v13 = vpop.f32.mrf.mxu1 }
  0xe5   :  { %v207_v14 = vadd.f32 %v203_v13, %v130_v11 }
  0xe6   :  { %v379_v15 = vpop.f32.mrf.mxu1 }
  0xe7   :  { %v346_v16 = vmul.f32 -1.442695, %v207_v14 }
  0xe9   :  { %401 = vpow2.f32 %v346_v16 }
  0xf6   :  { %v402_v22 = vpop.eup %401 }
  0xf7   :  { %v211_v23 = vadd.f32 1.0, %v402_v22 }
  0xf9   :  { %403 = vrcp.f32 %v211_v23 }
 0x106   :  { %v404_v24 = vpop.eup %403 }
 0x107   :  { %v217_v25 = vmul.f32 %v404_v24, %v215_v17  ;;  %v315_v32 = vsub.f32 1.0, %v404_v24 }
 0x109   :  { %219 = vrot.lane.b32.xlu1 %v217_v25, %s481_s3  ;;  %v316_v34 = vmul.f32 %v315_v32, %v45_v8 }
 0x17b   :  { %v220_v26 = vpop.permute.xlu1 %219 }
 0x17c   :  { %389 = vmatmul.mubr.msk.f32.vlgmr.msra.gmra.mxu0 %vm133_vm2, %v220_v26 }
 0x23c   :  { %v305_v27 = vpop.f32.mrf.mxu0 }
 0x23d   :  { %310 = vrot.lane.b32.xlu0 %v305_v27, %s480_s0 }
 0x23e   :  { %v390_v28 = vpop.f32.mrf.mxu0 }
 0x2af   :  { %v311_v29 = vpop.permute.xlu0 %310 }
 0x2b0   :  { %v313_v30 = vadd.f32 %v311_v29, %v130_v11 }
 0x2b2   :  { %405 = vtanh.f32 %v313_v30 }
 0x2bf   :  { %v406_v31 = vpop.eup %405 }
 0x2c0   :  { %318 = vrot.lane.b32.xlu1 %v406_v31, %s480_s0 }
 0x332   :  { %v319_v33 = vpop.permute.xlu1 %318 }
 0x333   :  { %v321_v35 = vmul.f32 %v404_v24, %v319_v33 }
 0x335   :  { %v322_v36 = vadd.f32 %v321_v35, %v316_v34 }
 0x337   :  { %v348_v37 = vclamps-f32 %v322_v36, 1.0 }
 0x339   :  { %326 = vst.msk [vmem:[#allocation7] sm:$0x3] %vm325_vm3, %v348_v37 }
 0x33a   :  { %458 = shalt.err (!%p455_p0)
}
 0x33b   :  { %336 = dma.vmem_to_hbm [thread:$0]  %s334_s5, 32, %s538_s4, [#allocation4]  }
 0x33c   :  { %471 = dma.done.wait [#allocation4], 32  }
 0x33d   :  { %472 = vsyncadd [#allocation4], 4294967264 }
 0x33e   :  { %340 = vsyncpa [#allocation3], 1 }
 0x33f   :  { %341 = vsyncpa [#allocation6], 1 }
 0x340   :  { %342 = vsyncpa [#allocation4], 1 }

</bundles_post_ra>
